<compile_context>
chip_gen: v6e
topology: v6e:2x2x1
jax: 0.10.0
libtpu: 0.0.40
codegen_flags: <defaults>
</compile_context>

<pallas_src>
import functools

import jax
import jax.numpy as jnp
from jax.experimental import pallas as pl
from jax.experimental.pallas import tpu as pltpu


def _channel_shuffle_kernel(x_ref, o_ref, *, groups, cpg):
    """x_ref / o_ref: (1, C, THW) with C = groups * cpg.

    out[:, cp*groups + gr, :] = in[:, gr*cpg + cp, :]
    """
    if groups == 1 or cpg == 1:
        # Identity permutation -> straight tile copy.
        o_ref[...] = x_ref[...]
        return

    for cp in range(cpg):
        for gr in range(groups):
            co = cp * groups + gr
            ci = gr * cpg + cp
            o_ref[0, co:co + 1, :] = x_ref[0, ci:ci + 1, :]


def _pick_hw_tile(hw, c, itemsize, budget_bytes=2 * 1024 * 1024):
    """Largest spatial tile that divides hw, is a multiple of 128 (or the full
    extent) and keeps one (C, THW) block under budget_bytes."""
    if c * hw * itemsize <= budget_bytes:
        return hw
    # Largest multiple-of-128 candidate that fits the per-block budget.
    max_t = max(128, (budget_bytes // (c * itemsize)) // 128 * 128)
    for t in range(max_t, 127, -128):
        if hw % t == 0:
            return t
    # No suitable divisor: fall back to the full extent (always correct).
    return hw


def channel_shuffle_forward(x_nchw, groups):
    """Channel shuffle on an NCHW tensor (matches torch channel_shuffle)."""
    N, C, H, W = x_nchw.shape
    assert C % groups == 0, "num_channels must be divisible by groups"
    cpg = C // groups
    HW = H * W

    xr = x_nchw.reshape(N, C, HW)          # free reshape of contiguous NCHW
    thw = _pick_hw_tile(HW, C, xr.dtype.itemsize)
    n_hw_tiles = HW // thw

    kernel = functools.partial(_channel_shuffle_kernel, groups=groups, cpg=cpg)

    out = pl.pallas_call(
        kernel,
        out_shape=jax.ShapeDtypeStruct((N, C, HW), xr.dtype),
        grid_spec=pltpu.PrefetchScalarGridSpec(
            num_scalar_prefetch=0,
            grid=(N, n_hw_tiles),
            in_specs=[pl.BlockSpec((1, C, thw), lambda n, t: (n, 0, t))],
            out_specs=pl.BlockSpec((1, C, thw), lambda n, t: (n, 0, t)),
        ),
        compiler_params=pltpu.CompilerParams(
            dimension_semantics=("parallel", "parallel")),
    )(xr)

    return out.reshape(N, C, H, W)


def _reference_channel_shuffle(x, groups):
    """Pure-JAX reference matching torch channel_shuffle."""
    N, C, H, W = x.shape
    cpg = C // groups
    y = x.reshape(N, groups, cpg, H, W)
    y = jnp.transpose(y, (0, 2, 1, 3, 4))
    return y.reshape(N, C, H, W)


if __name__ == "__main__":
    N, C, H, W = 2, 4, 16, 16
    groups = 2

    key = jax.random.PRNGKey(0)
    x = jax.random.normal(key, (N, C, H, W), jnp.float32)

    out = channel_shuffle_forward(x, groups)
    out = jax.block_until_ready(out)

    ref = _reference_channel_shuffle(x, groups)
    assert out.shape == (N, C, H, W)
    assert jnp.array_equal(out, ref), "mismatch vs reference"

    print("KERNEL_OK")
</pallas_src>

<mosaic_0001>
module attributes {stable_mosaic.version = 11 : i64} {
  func.func @_channel_shuffle_kernel(%arg0: i32, %arg1: i32, %arg2: memref<1x4x256xf32, #tpu.memory_space<vmem>>, %arg3: memref<1x4x256xf32, #tpu.memory_space<vmem>>) attributes {dimension_semantics = [#tpu.dimension_semantics<parallel>, #tpu.dimension_semantics<parallel>], iteration_bounds = array<i64: 2, 1>, scalar_prefetch = 0 : i64, scratch_operands = 0 : i64, tpu.core_type = #tpu.core_type<tc>, window_params = [{transform_indices = @transform_0, window_bounds = array<i64: 1, 4, 256>}, {transform_indices = @transform_1, window_bounds = array<i64: 1, 4, 256>}]} {
    %c0 = arith.constant 0 : index
    %c0_0 = arith.constant 0 : index
    %c0_1 = arith.constant 0 : index
    %0 = vector.load %arg2[%c0, %c0_0, %c0_1] : memref<1x4x256xf32, #tpu.memory_space<vmem>>, vector<1x1x256xf32>
    %1 = vector.shape_cast %0 : vector<1x1x256xf32> to vector<1x256xf32>
    %c0_2 = arith.constant 0 : index
    %c0_3 = arith.constant 0 : index
    %c0_4 = arith.constant 0 : index
    %2 = vector.load %arg3[%c0_2, %c0_3, %c0_4] : memref<1x4x256xf32, #tpu.memory_space<vmem>>, vector<1x1x256xf32>
    %3 = vector.shape_cast %2 : vector<1x1x256xf32> to vector<1x256xf32>
    %4 = vector.shape_cast %1 : vector<1x256xf32> to vector<1x1x256xf32>
    tpu.vector_store %arg3[%c0_2, %c0_3, %c0_4], %4 {strides = array<i32>} : memref<1x4x256xf32, #tpu.memory_space<vmem>>, vector<1x1x256xf32>,
    %c0_5 = arith.constant 0 : index
    %c2 = arith.constant 2 : index
    %c0_6 = arith.constant 0 : index
    %5 = vector.load %arg2[%c0_5, %c2, %c0_6] : memref<1x4x256xf32, #tpu.memory_space<vmem>>, vector<1x1x256xf32>
    %6 = vector.shape_cast %5 : vector<1x1x256xf32> to vector<1x256xf32>
    %c0_7 = arith.constant 0 : index
    %c1 = arith.constant 1 : index
    %c0_8 = arith.constant 0 : index
    %7 = vector.load %arg3[%c0_7, %c1, %c0_8] : memref<1x4x256xf32, #tpu.memory_space<vmem>>, vector<1x1x256xf32>
    %8 = vector.shape_cast %7 : vector<1x1x256xf32> to vector<1x256xf32>
    %9 = vector.shape_cast %6 : vector<1x256xf32> to vector<1x1x256xf32>
    tpu.vector_store %arg3[%c0_7, %c1, %c0_8], %9 {strides = array<i32>} : memref<1x4x256xf32, #tpu.memory_space<vmem>>, vector<1x1x256xf32>,
    %c0_9 = arith.constant 0 : index
    %c1_10 = arith.constant 1 : index
    %c0_11 = arith.constant 0 : index
    %10 = vector.load %arg2[%c0_9, %c1_10, %c0_11] : memref<1x4x256xf32, #tpu.memory_space<vmem>>, vector<1x1x256xf32>
    %11 = vector.shape_cast %10 : vector<1x1x256xf32> to vector<1x256xf32>
    %c0_12 = arith.constant 0 : index
    %c2_13 = arith.constant 2 : index
    %c0_14 = arith.constant 0 : index
    %12 = vector.load %arg3[%c0_12, %c2_13, %c0_14] : memref<1x4x256xf32, #tpu.memory_space<vmem>>, vector<1x1x256xf32>
    %13 = vector.shape_cast %12 : vector<1x1x256xf32> to vector<1x256xf32>
    %14 = vector.shape_cast %11 : vector<1x256xf32> to vector<1x1x256xf32>
    tpu.vector_store %arg3[%c0_12, %c2_13, %c0_14], %14 {strides = array<i32>} : memref<1x4x256xf32, #tpu.memory_space<vmem>>, vector<1x1x256xf32>,
    %c0_15 = arith.constant 0 : index
    %c3 = arith.constant 3 : index
    %c0_16 = arith.constant 0 : index
    %15 = vector.load %arg2[%c0_15, %c3, %c0_16] : memref<1x4x256xf32, #tpu.memory_space<vmem>>, vector<1x1x256xf32>
    %16 = vector.shape_cast %15 : vector<1x1x256xf32> to vector<1x256xf32>
    %c0_17 = arith.constant 0 : index
    %c3_18 = arith.constant 3 : index
    %c0_19 = arith.constant 0 : index
    %17 = vector.load %arg3[%c0_17, %c3_18, %c0_19] : memref<1x4x256xf32, #tpu.memory_space<vmem>>, vector<1x1x256xf32>
    %18 = vector.shape_cast %17 : vector<1x1x256xf32> to vector<1x256xf32>
    %19 = vector.shape_cast %16 : vector<1x256xf32> to vector<1x1x256xf32>
    tpu.vector_store %arg3[%c0_17, %c3_18, %c0_19], %19 {strides = array<i32>} : memref<1x4x256xf32, #tpu.memory_space<vmem>>, vector<1x1x256xf32>,
    return
  }
  func.func @transform_0(%arg0: i32, %arg1: i32) -> (i32, i32, i32) {
    %c0_i32 = arith.constant 0 : i32
    %c0_i32_0 = arith.constant 0 : i32
    return %arg0, %c0_i32, %arg1 : i32, i32, i32
  }
  func.func @transform_1(%arg0: i32, %arg1: i32) -> (i32, i32, i32) {
    %c0_i32 = arith.constant 0 : i32
    %c0_i32_0 = arith.constant 0 : i32
    return %arg0, %c0_i32, %arg1 : i32, i32, i32
  }
}

</mosaic_0001>

<bundles_post_ra>
// kernel: tpu_custom_call.1
= control target key start
LH: loop header
LB: loop body
LE: loop exit
PB: predicated region body
PF: predicated region fallthrough
CT: control target
= control target key end

     0   :  { %6 = vsyncpa [#allocation3], 0  ;;  %s625_s0 = inlined_call_operand.hbm [shape: f32[2,4,256], index: 0, kind: input, shape index: {}]   ;;  %s626_s1 = inlined_call_operand.hbm [shape: f32[2,4,256], index: 1, kind: output, shape index: {}]  }
   0x1   :  { %8 = vsyncpa [#allocation3 + $0x1], 0 }
   0x2   :  { %9 = vsyncpa [#allocation4], 0 }
   0x3   :  { %11 = vsyncpa [#allocation4 + $0x1], 0  ;;  %s479_s6 = smov 0   ;;  %s481_s7 = smov 0  }
   0x4   :  { %s483_s8 = smov 0   ;;  %s485_s9 = smov 0  }
   0x5   :  { %s487_s10 = smov 0   ;;  %s489_s11 = smov 0  }
   0x6 LB: > { %s272_s12 = sadd.s32 4294967295, %s465_s11   ;;  %s273_s13 = sadd.s32 4294967294, %s465_s11   ;;  %s465_s11 = sphi %s489_s11, %s17_s11   ;;  %s461_s10 = sphi %s487_s10, %s638_s10   ;;  %s457_s9 = sphi %s485_s9, %s637_s9   ;;  %s453_s8 = sphi %s483_s8, %s636_s8   ;;  %s449_s7 = sphi %s481_s7, %s635_s7   ;;  %s445_s6 = sphi %s479_s6, %s634_s6  }
   0x7   : > { %s29_s14 = sadd.s32 1, %s461_s10  ;;  %s38_s15 = sadd.s32 1, %s453_s8 }
   0x8   : > { %p31_p0 = scmp.ge.s32.totalorder %s29_s14, 2  ;;  %p45_p1 = scmp.ne.s32.totalorder %s453_s8, %s449_s7 }
   0x9   : > { %p46_p2 = scmp.eq.s32.totalorder %s465_s11, 0  ;;  %p51_p3 = scmp.ne.s32.totalorder %s449_s7, %s445_s6 }
   0xa   : > { %s640_s14 = smov (%p31_p0, %s29_s14), 0  ;;  %p52_p5 = scmp.eq.s32.totalorder %s272_s12, 0 }
   0xb   : > { %p520_p4 = por %p46_p2, %p45_p1  ;;  %s33_s17 = ssub.s32 %s461_s10, %s640_s14 }
   0xc   : > { %p77_p6 = scmp.eq.s32.totalorder %s272_s12, 1  ;;  %p36_p7 = scmp.eq.s32.totalorder %s33_s17, 0 }
   0xd   : > { %p526_p8 = por %p52_p5, %p51_p3  ;;  %p83_p10 = scmp.eq.s32.totalorder %s273_s13, 1 }
   0xe   : > { %p530_p9 = por %p77_p6, %p45_p1  ;;  %p307_p13 = scmp.lt.s32.totalorder %s465_s11, 2 }
   0xf   : > { %s535_s20 = scalar_select %p36_p7, %s453_s8, %s38_s15  }
  0x10   : > { %p537_p11 = por %p83_p10, %p51_p3  ;;  %s103_s22 = sand.u32 1, %s453_s8  }
  0x11   : > { %s276_s23 = sshll.u32 %s103_s22, 3  ;;  %s293_s24 = sshll.u32 %s461_s10, 7 }
  0x12   : > { %s630_s21 = scalar_select %p537_p11, 1, 0 }
  0x13   : > { %s115_s27 = scalar_lea.hbm %s625_s0, %s293_s24  ;;  %s107_s28 = scalar_lea.vmem [#allocation2], %s276_s23 }
  0x14   : > { %s117_s29 = sshll.u32 %s107_s28, 4  ;;  %p550_p0 = pnand %p307_p13, %p520_p4  ;;  %s118_s29 = int_to_ptr.vmem [resolvable:$true] %s117_s29 }
  0x15   : > { %p279_p1 = scmp.ge.s32.totalorder %s465_s11, 1  ;;  %p122_p2 = scmp.lt.s32.totalorder %s465_s11, 3 }
  0x16   : > { %s104_s2 = scalar_lea.sflag [#allocation3], %s103_s22  ;;  %p359_p3 = pneg %p550_p0 }
  0x17   : > { %s370_s3 = scalar_lea.vmem %s118_s29, 128  ;;  %s467_s4 = smov [#allocation2]  }
  0x18   : > { %p371_p5 = scmp.ne.s32.totalorder %s118_s29, %s370_s3  ;;  %s375_s5 = sshll.u32 %s467_s4, 4  ;;  %s376_s5 = int_to_ptr.vmem [resolvable:$false] %s375_s5 }
  0x19   : > { %s377_s12 = scalar_lea.vmem %s376_s5, 256  ;;  %p378_p10 = scmp.lt.s32.totalorder %s118_s29, %s376_s5 }
  0x1a   : > { %p373_p6 = pnand %p371_p5, %p359_p3  ;;  %p379_p12 = scmp.lt.s32.totalorder %s377_s12, %s370_s3 }
  0x1c   : > { %p374_p7 = pneg %p373_p6  ;;  %p380_p4 = por %p379_p12, %p378_p10 }
  0x1e   : > { %p381_p13 = pnand %p380_p4, %p374_p7 }
  0x20   : > { %384 = shalt.err (!%p381_p13)
}
  0x21   : > { %302 = dma.hbm_to_vmem [thread:$0]  (!%p550_p0), %s115_s27, 128, %s118_s29, %s104_s2  }
  0x22   : > { %p123_p11 = pnand %p279_p1, %p122_p2 }
  0x23   : > { %s565_s13 = sand.u32 (!%p123_p11), 1, %s449_s7  }
  0x24   : > { %126 = sbr.rel (%p123_p11) target bundleno = 68 (0x44), region = 24  ;;  %s280_s15 = sshll.u32 (!%p123_p11), %s565_s13, 3 }
  0x25   : > { %s129_s16 = scalar_lea.sflag (!%p123_p11), [#allocation3], %s565_s13  ;;  %s132_s17 = scalar_lea.vmem (!%p123_p11), [#allocation2], %s280_s15 }
  0x29   : > { %436 = dma.done.wait (%p526_p8), %s129_s16, 128  }
  0x2a   : > { %438 = vsyncadd (%p526_p8), %s129_s16, 4294967168  ;;  %v154_v0 = vlaneseq  ;;  %s150_s22 = scalar_lea.vmem [#allocation5], %s280_s15  ;;  %s294_s24 = sshll.u32 %s457_s9, 7  ;;  %v153_v1 = vld [vmem:[%s132_s17] ss:$4 sm:$0x3] }
  0x2b   : > { %s188_s23 = sshll.u32 %s150_s22, 4  ;;  %v282_v2 = vld [vmem:[%s132_s17 + $0x2] ss:$4 sm:$0x3]  ;;  %s579_s27 = scalar_lea.hbm %s626_s1, %s294_s24  ;;  %s574_s23 = int_to_ptr.vmem [resolvable:$true] %s188_s23 }
  0x2c   : > { %vm156_vm0 = vcmp.lt.s32.totalorder %v154_v0, 256  ;;  %v284_v3 = vld [vmem:[%s132_s17 + $0x1] ss:$4 sm:$0x3]  ;;  %s172_s9 = scalar_lea.sflag [#allocation4], %s565_s13  ;;  %s385_s18 = scalar_lea.vmem %s574_s23, 128 }
  0x2d   : > { %158 = vst.msk [vmem:[%s150_s22] ss:$4 sm:$0x3] %vm156_vm0, %v153_v1  ;;  %283 = vst.msk [vmem:[%s150_s22 + $0x1] ss:$4 sm:$0x3] %vm156_vm0, %v282_v2  ;;  %p386_p8 = scmp.ne.s32.totalorder %s574_s23, %s385_s18 }
  0x2e   : > { %v286_v4 = vld [vmem:[%s132_s17 + $0x3] ss:$4 sm:$0x3]  ;;  %285 = vst.msk [vmem:[%s150_s22 + $0x2] ss:$4 sm:$0x3] %vm156_vm0, %v284_v3 }
  0x2f   : > { %287 = vst.msk [vmem:[%s150_s22 + $0x3] ss:$4 sm:$0x3] %vm156_vm0, %v286_v4  ;;  %p387_p11 = pnand %p386_p8, %p530_p9  ;;  %s468_s28 = smov [#allocation5]  }
  0x30   : > { %s389_s29 = sshll.u32 %s468_s28, 4  ;;  %s390_s29 = int_to_ptr.vmem [resolvable:$false] %s389_s29 }
  0x31   : > { %p388_p12 = pneg %p387_p11  ;;  %s391_s30 = scalar_lea.vmem %s390_s29, 256 }
  0x32   : > { %p392_p0 = scmp.lt.s32.totalorder %s574_s23, %s390_s29  ;;  %p393_p1 = scmp.lt.s32.totalorder %s391_s30, %s385_s18 }
  0x34   : > { %p394_p2 = por %p393_p1, %p392_p0 }
  0x36   : > { %p395_p3 = pnand %p394_p2, %p388_p12 }
  0x38   : > { %398 = shalt.err (!%p395_p3)
}
  0x39   : > { %s399_s2 = scalar_lea.hbm %s579_s27, 128  ;;  %s403_s5 = scalar_lea.hbm %s626_s1, 256 }
  0x3a   : > { %p400_p5 = scmp.ne.s32.totalorder %s579_s27, %s399_s2  ;;  %p404_p10 = scmp.lt.s32.totalorder %s579_s27, %s626_s1 }
  0x3b   : > { %p405_p4 = scmp.lt.s32.totalorder %s403_s5, %s399_s2 }
  0x3c   : > { %p401_p6 = pnand %p400_p5, %p530_p9 }
  0x3d   : > { %p406_p13 = por %p405_p4, %p404_p10 }
  0x3e   : > { %p402_p7 = pneg %p401_p6 }
  0x40   : > { %p407_p8 = pnand %p406_p13, %p402_p7 }
  0x42   : > { %410 = shalt.err (!%p407_p8)
}
  0x43   : > { %297 = dma.vmem_to_hbm [thread:$0]  (%p530_p9), %s574_s23, 128, %s579_s27, %s172_s9  }
  0x44 PF: > { %s200_s15 = sand.u32 1, %s445_s6   ;;  %p632_p11 = scmp.ne.s32.totalorder %s630_s21, 0 }
  0x45   : > { %p633_p12 = scmp.ge.s32.totalorder %s465_s11, 2  ;;  %s201_s16 = scalar_lea.sflag [#allocation4], %s200_s15 }
  0x47   : > { %p304_p0 = pnand %p633_p12, %p632_p11 }
  0x49   : > { %p305_p1 = pneg %p304_p0 }
  0x4b   : > { %440 = dma.done.wait (%p305_p1), %s201_s16, 128  }
  0x4c   : > { %442 = vsyncadd (%p305_p1), %s201_s16, 4294967168  ;;  %s17_s11 = sadd.s32 1, %s465_s11   ;;  %s634_s6 = smov %s449_s7 }
  0x4d   : > { %p14_p2 = scmp.ge.s32.totalorder %s17_s11, 4   ;;  %s635_s7 = smov %s453_s8 }
  0x4e   : > { %s636_s8 = smov %s535_s20  ;;  %s637_s9 = smov %s461_s10 }
  0x4f   : > { %s638_s10 = smov %s640_s14  ;;  %16 = sbr.rel (!%p14_p2) target bundleno = 6 (0x6), region = 75 }
  0x54   :  { %206 = vsyncpa [#allocation3], 1 }
  0x55   :  { %208 = vsyncpa [#allocation3 + $0x1], 1 }
  0x56   :  { %209 = vsyncpa [#allocation4], 1 }
  0x57   :  { %211 = vsyncpa [#allocation4 + $0x1], 1 }

</bundles_post_ra>
